<compile_context>
chip_gen: v6e
topology: v6e:2x2x1
jax: 0.10.0
libtpu: 0.0.40
codegen_flags: <defaults>
</compile_context>

<pallas_src>
import functools

import jax
import jax.numpy as jnp
from jax.experimental import pallas as pl
from jax.experimental.pallas import tpu as pltpu

LANE = 128      # vreg lane width
NEG = -1e30     # bias for padded attention-logit columns -> exp() underflows to 0


def _round_up(x, m):
    return (x + m - 1) // m * m


# ----------------------------- Pallas kernel -----------------------------

def _ssa_kernel(v_ref, mask_ref, g_ref, w_ref, b_ref,
                wgo_ref, wgg_ref, bg_ref, o_ref):
    """Fused SimpleSelfAttention forward for one tile of Bt whole graphs.

    v_ref    : (Bt, N, D)   bf16 node features
    mask_ref : (Bt, N, 1)   f32 validity mask (0 on invalid nodes)
    g_ref    : (Bt, Gp)     f32 global state, zero-padded to Gp lanes
    w_ref    : (D, 2*Hp)    bf16 fused [Wa | Wf] projection weights
    b_ref    : (1, 2*Hp)    f32 [ba | bf] (padded ba columns = -1e30)
    wgo_ref  : (Hp, Gp)     f32 glb weight rows acting on `out`
    wgg_ref  : (Gp, Gp)     f32 glb weight rows acting on `g`
    bg_ref   : (1, Gp)      f32
    o_ref    : (Bt, Gp)     f32
    """
    bt, n, d = v_ref.shape
    hp = wgo_ref.shape[0]

    # one MXU push for both projections (bf16 inputs, f32 accumulate)
    v = v_ref[...].reshape(bt * n, d)
    proj = jnp.dot(v, w_ref[...], preferred_element_type=jnp.float32) + b_ref[...]
    logits = proj[:, :hp]
    feat = proj[:, hp:]

    # softmax over the (padded) hidden axis; padded columns carry a -1e30 bias
    logits = logits - jnp.max(logits, axis=-1, keepdims=True)
    e = jnp.exp(logits)
    att = e * pl.reciprocal(jnp.sum(e, axis=-1, keepdims=True), approx=False)

    # (att * feat * mask).sum(dim=1): masked per-graph sublane reduction
    weighted = att * feat * mask_ref[...].reshape(bt * n, 1)   # (Bt*N, Hp)
    out = jnp.sum(weighted.reshape(bt, n, hp), axis=1)         # (Bt, Hp)

    g = g_ref[...]
    pre = (jnp.dot(out, wgo_ref[...], preferred_element_type=jnp.float32)
           + jnp.dot(g, wgg_ref[...], preferred_element_type=jnp.float32)
           + bg_ref[...])
    o_ref[...] = g + jnp.tanh(pre)


# ----------------------------- wrappers -----------------------------

def prepare_params(p, in_dim, h_dim, g_dim):
    """Pad the (in, out)-layout weights to lane-dense shapes (done once, host side)."""
    hp, gp = _round_up(h_dim, LANE), _round_up(g_dim, LANE)
    wa = jnp.zeros((in_dim, hp), jnp.float32).at[:, :h_dim].set(p["wa"])
    ba = jnp.full((1, hp), NEG, jnp.float32).at[:, :h_dim].set(p["ba"])
    wf = jnp.zeros((in_dim, hp), jnp.float32).at[:, :h_dim].set(p["wf"])
    bf = jnp.zeros((1, hp), jnp.float32).at[:, :h_dim].set(p["bf"])
    wgo = jnp.zeros((hp, gp), jnp.float32).at[:h_dim, :g_dim].set(p["wg"][:h_dim])
    wgg = jnp.zeros((gp, gp), jnp.float32).at[:g_dim, :g_dim].set(p["wg"][h_dim:])
    bg = jnp.zeros((1, gp), jnp.float32).at[:, :g_dim].set(p["bg"])
    return {"w": jnp.concatenate([wa, wf], axis=1).astype(jnp.bfloat16),  # (D, 2*Hp)
            "b": jnp.concatenate([ba, bf], axis=1),                       # (1, 2*Hp) f32
            "wgo": wgo, "wgg": wgg, "bg": bg}


def _choose_bt(batch, n, hp, d):
    """Graphs per tile: keep the per-tile live set well under the scoped VMEM limit."""
    # rough f32 live bytes per graph: proj/att/feat/weighted (~6x N*Hp) + dbl-buffered v/mask
    per_graph = 6 * n * hp * 4 + 2 * n * (2 * d + 4)
    budget = 8 << 20                     # ~8 MiB live set (limit below is 32 MiB)
    bt = max(1, budget // max(per_graph, 1))
    if bt >= batch:
        return batch                     # single block over the whole batch
    return max(8, (bt // 8) * 8)         # keep the (8,128)-constraint on (Bt, Gp) blocks


@functools.partial(jax.jit, static_argnames=("g_dim",))
def simple_self_attention(pp, v, mask, g=None, *, g_dim):
    B, N, D = v.shape
    hp, gp = pp["wgo"].shape
    if g is None:
        g = jnp.zeros((B, g_dim), jnp.float32)

    bt = _choose_bt(B, N, hp, D)
    grid = (pl.cdiv(B, bt),)

    v_b = v.astype(jnp.bfloat16)                             # halve the dominant HBM stream
    m_f = mask.astype(jnp.float32).reshape(B, N, 1)          # no padded copy, natural shape
    g_p = jnp.zeros((B, gp), jnp.float32).at[:, :g_dim].set(g)

    out = pl.pallas_call(
        _ssa_kernel,
        out_shape=jax.ShapeDtypeStruct((B, gp), jnp.float32),
        grid=grid,
        in_specs=[
            pl.BlockSpec((bt, N, D), lambda i: (i, 0, 0)),   # v: whole graphs per tile
            pl.BlockSpec((bt, N, 1), lambda i: (i, 0, 0)),   # mask
            pl.BlockSpec((bt, gp), lambda i: (i, 0)),        # g
            pl.BlockSpec((D, 2 * hp), lambda i: (0, 0)),     # fused [Wa|Wf]
            pl.BlockSpec((1, 2 * hp), lambda i: (0, 0)),     # fused [ba|bf]
            pl.BlockSpec((hp, gp), lambda i: (0, 0)),        # Wg rows for `out`
            pl.BlockSpec((gp, gp), lambda i: (0, 0)),        # Wg rows for `g`
            pl.BlockSpec((1, gp), lambda i: (0, 0)),         # bg
        ],
        out_specs=pl.BlockSpec((bt, gp), lambda i: (i, 0)),
        compiler_params=pltpu.CompilerParams(
            dimension_semantics=("parallel",),               # megacore split on v7x
            vmem_limit_bytes=32 << 20),
    )(v_b, m_f, g_p, pp["w"], pp["b"], pp["wgo"], pp["wgg"], pp["bg"])
    return out[:, :g_dim]


# ----------------------------- params / reference -----------------------------

def init_params(key, in_dim, h_dim, g_dim):
    def lin(k, din, dout):
        s = float(din) ** -0.5
        kw, kb = jax.random.split(k)
        return (jax.random.uniform(kw, (din, dout), jnp.float32, -s, s),
                jax.random.uniform(kb, (1, dout), jnp.float32, -s, s))
    k1, k2, k3 = jax.random.split(key, 3)
    wa, ba = lin(k1, in_dim, h_dim)
    wf, bf = lin(k2, in_dim, h_dim)
    wg, bg = lin(k3, h_dim + g_dim, g_dim)
    return {"wa": wa, "ba": ba, "wf": wf, "bf": bf, "wg": wg, "bg": bg}


def reference(p, v, mask, g):
    att = jax.nn.softmax(jnp.einsum("bnd,dh->bnh", v, p["wa"]) + p["ba"], axis=-1)
    feat = jnp.einsum("bnd,dh->bnh", v, p["wf"]) + p["bf"]
    out = (att * feat * mask).sum(axis=1)
    pre = jnp.concatenate([out, g], axis=-1) @ p["wg"] + p["bg"]
    return g + jnp.tanh(pre)


if __name__ == "__main__":
    IN_DIM, H_DIM, G_DIM = 4, 32, 16
    B, N = 2, 8

    key = jax.random.PRNGKey(0)
    kv, kg, kp = jax.random.split(key, 3)

    v = jax.random.normal(kv, (B, N, IN_DIM), jnp.float32)
    lengths = jnp.array([5, 8], jnp.int32)                       # per-graph valid nodes
    mask = (jnp.arange(N)[None, :] < lengths[:, None]).astype(jnp.float32)[..., None]
    g = jax.random.normal(kg, (B, G_DIM), jnp.float32)

    params = init_params(kp, IN_DIM, H_DIM, G_DIM)
    padded = prepare_params(params, IN_DIM, H_DIM, G_DIM)

    y = simple_self_attention(padded, v, mask, g, g_dim=G_DIM)
    jax.block_until_ready(y)
    assert y.shape == (B, G_DIM)

    y_ref = reference(params, v, mask, g)
    assert jnp.allclose(y, y_ref, atol=2e-2, rtol=2e-2), (
        f"max abs err {float(jnp.max(jnp.abs(y - y_ref)))}")
    print("KERNEL_OK")
</pallas_src>

<mosaic_0001>
module attributes {stable_mosaic.version = 11 : i64} {
  func.func @_ssa_kernel(%arg0: i32, %arg1: memref<2x8x4xbf16, #tpu.memory_space<vmem>>, %arg2: memref<2x8x1xf32, #tpu.memory_space<vmem>>, %arg3: memref<2x128xf32, #tpu.memory_space<vmem>>, %arg4: memref<4x256xbf16, #tpu.memory_space<vmem>>, %arg5: memref<1x256xf32, #tpu.memory_space<vmem>>, %arg6: memref<128x128xf32, #tpu.memory_space<vmem>>, %arg7: memref<128x128xf32, #tpu.memory_space<vmem>>, %arg8: memref<1x128xf32, #tpu.memory_space<vmem>>, %arg9: memref<2x128xf32, #tpu.memory_space<vmem>>) attributes {dimension_semantics = [#tpu.dimension_semantics<parallel>], iteration_bounds = array<i64: 1>, scalar_prefetch = 0 : i64, scratch_operands = 0 : i64, tpu.core_type = #tpu.core_type<tc>, window_params = [{transform_indices = @transform_0, window_bounds = array<i64: 2, 8, 4>}, {transform_indices = @transform_1, window_bounds = array<i64: 2, 8, 1>}, {transform_indices = @transform_2, window_bounds = array<i64: 2, 128>}, {pipeline_mode = #tpu.pipeline_mode<synchronous>, transform_indices = @transform_3, window_bounds = array<i64: 4, 256>}, {pipeline_mode = #tpu.pipeline_mode<synchronous>, transform_indices = @transform_4, window_bounds = array<i64: 1, 256>}, {pipeline_mode = #tpu.pipeline_mode<synchronous>, transform_indices = @transform_5, window_bounds = array<i64: 128, 128>}, {pipeline_mode = #tpu.pipeline_mode<synchronous>, transform_indices = @transform_6, window_bounds = array<i64: 128, 128>}, {pipeline_mode = #tpu.pipeline_mode<synchronous>, transform_indices = @transform_7, window_bounds = array<i64: 1, 128>}, {transform_indices = @transform_8, window_bounds = array<i64: 2, 128>}]} {
    %c0 = arith.constant 0 : index
    %c0_0 = arith.constant 0 : index
    %c0_1 = arith.constant 0 : index
    %0 = vector.load %arg1[%c0, %c0_0, %c0_1] : memref<2x8x4xbf16, #tpu.memory_space<vmem>>, vector<2x8x4xbf16>
    %1 = vector.shape_cast %0 : vector<2x8x4xbf16> to vector<16x4xbf16>
    %c0_2 = arith.constant 0 : index
    %c0_3 = arith.constant 0 : index
    %2 = vector.load %arg4[%c0_2, %c0_3] : memref<4x256xbf16, #tpu.memory_space<vmem>>, vector<4x256xbf16>
    %cst = arith.constant dense<0.000000e+00> : vector<16x256xf32>
    %3 = tpu.matmul %1, %2, %cst {dimension_numbers = #tpu.dot_dimension_numbers<[1], [0], [0], [1], [0, 0, 1, 1], [], []>} : vector<16x4xbf16>, vector<4x256xbf16>, vector<16x256xf32> -> vector<16x256xf32>
    %c0_4 = arith.constant 0 : index
    %c0_5 = arith.constant 0 : index
    %4 = vector.load %arg5[%c0_4, %c0_5] : memref<1x256xf32, #tpu.memory_space<vmem>>, vector<1x256xf32>
    %5 = vector.broadcast %4 : vector<1x256xf32> to vector<16x256xf32>
    %6 = arith.addf %3, %5 : vector<16x256xf32>
    %7 = vector.extract_strided_slice %6 {offsets = [0, 0], sizes = [16, 128], strides = [1, 1]} : vector<16x256xf32> to vector<16x128xf32>
    %8 = vector.extract_strided_slice %6 {offsets = [0, 128], sizes = [16, 128], strides = [1, 1]} : vector<16x256xf32> to vector<16x128xf32>
    %cst_6 = arith.constant dense<0xFF800000> : vector<16xf32>
    %9 = vector.multi_reduction <maximumf>, %7, %cst_6 [1] : vector<16x128xf32> to vector<16xf32>
    %10 = vector.shape_cast %9 : vector<16xf32> to vector<16x1xf32>
    %11 = vector.broadcast %10 : vector<16x1xf32> to vector<16x128xf32>
    %12 = arith.subf %7, %11 : vector<16x128xf32>
    %13 = math.exp %12 : vector<16x128xf32>
    %cst_7 = arith.constant dense<0.000000e+00> : vector<16xf32>
    %14 = vector.multi_reduction <add>, %13, %cst_7 [1] : vector<16x128xf32> to vector<16xf32>
    %15 = vector.shape_cast %14 : vector<16xf32> to vector<16x1xf32>
    %16 = tpu.reciprocal %15 : vector<16x1xf32> -> vector<16x1xf32>
    %17 = vector.broadcast %16 : vector<16x1xf32> to vector<16x128xf32>
    %18 = arith.mulf %13, %17 : vector<16x128xf32>
    %19 = arith.mulf %18, %8 : vector<16x128xf32>
    %c0_8 = arith.constant 0 : index
    %c0_9 = arith.constant 0 : index
    %c0_10 = arith.constant 0 : index
    %20 = vector.load %arg2[%c0_8, %c0_9, %c0_10] : memref<2x8x1xf32, #tpu.memory_space<vmem>>, vector<2x8x1xf32>
    %21 = vector.shape_cast %20 : vector<2x8x1xf32> to vector<16x1xf32>
    %22 = vector.broadcast %21 : vector<16x1xf32> to vector<16x128xf32>
    %23 = arith.mulf %19, %22 : vector<16x128xf32>
    %24 = vector.shape_cast %23 : vector<16x128xf32> to vector<2x8x128xf32>
    %cst_11 = arith.constant dense<0.000000e+00> : vector<2x128xf32>
    %25 = vector.multi_reduction <add>, %24, %cst_11 [1] : vector<2x8x128xf32> to vector<2x128xf32>
    %c0_12 = arith.constant 0 : index
    %c0_13 = arith.constant 0 : index
    %26 = vector.load %arg3[%c0_12, %c0_13] : memref<2x128xf32, #tpu.memory_space<vmem>>, vector<2x128xf32>
    %c0_14 = arith.constant 0 : index
    %c0_15 = arith.constant 0 : index
    %27 = vector.load %arg6[%c0_14, %c0_15] : memref<128x128xf32, #tpu.memory_space<vmem>>, vector<128x128xf32>
    %cst_16 = arith.constant dense<0.000000e+00> : vector<2x128xf32>
    %28 = tpu.matmul %25, %27, %cst_16 {dimension_numbers = #tpu.dot_dimension_numbers<[1], [0], [0], [1], [0, 0, 1, 1], [], []>} : vector<2x128xf32>, vector<128x128xf32>, vector<2x128xf32> -> vector<2x128xf32>
    %c0_17 = arith.constant 0 : index
    %c0_18 = arith.constant 0 : index
    %29 = vector.load %arg7[%c0_17, %c0_18] : memref<128x128xf32, #tpu.memory_space<vmem>>, vector<128x128xf32>
    %cst_19 = arith.constant dense<0.000000e+00> : vector<2x128xf32>
    %30 = tpu.matmul %26, %29, %cst_19 {dimension_numbers = #tpu.dot_dimension_numbers<[1], [0], [0], [1], [0, 0, 1, 1], [], []>} : vector<2x128xf32>, vector<128x128xf32>, vector<2x128xf32> -> vector<2x128xf32>
    %31 = arith.addf %28, %30 : vector<2x128xf32>
    %c0_20 = arith.constant 0 : index
    %c0_21 = arith.constant 0 : index
    %32 = vector.load %arg8[%c0_20, %c0_21] : memref<1x128xf32, #tpu.memory_space<vmem>>, vector<1x128xf32>
    %33 = vector.broadcast %32 : vector<1x128xf32> to vector<2x128xf32>
    %34 = arith.addf %31, %33 : vector<2x128xf32>
    %35 = math.tanh %34 : vector<2x128xf32>
    %36 = arith.addf %26, %35 : vector<2x128xf32>
    %c0_22 = arith.constant 0 : index
    %c0_23 = arith.constant 0 : index
    %37 = vector.load %arg9[%c0_22, %c0_23] : memref<2x128xf32, #tpu.memory_space<vmem>>, vector<2x128xf32>
    tpu.vector_store %arg9[%c0_22, %c0_23], %36 {strides = array<i32>} : memref<2x128xf32, #tpu.memory_space<vmem>>, vector<2x128xf32>,
    return
  }
  func.func @transform_0(%arg0: i32) -> (i32, i32, i32) {
    %c0_i32 = arith.constant 0 : i32
    %c0_i32_0 = arith.constant 0 : i32
    %c0_i32_1 = arith.constant 0 : i32
    return %arg0, %c0_i32, %c0_i32_0 : i32, i32, i32
  }
  func.func @transform_1(%arg0: i32) -> (i32, i32, i32) {
    %c0_i32 = arith.constant 0 : i32
    %c0_i32_0 = arith.constant 0 : i32
    %c0_i32_1 = arith.constant 0 : i32
    return %arg0, %c0_i32, %c0_i32_0 : i32, i32, i32
  }
  func.func @transform_2(%arg0: i32) -> (i32, i32) {
    %c0_i32 = arith.constant 0 : i32
    %c0_i32_0 = arith.constant 0 : i32
    return %arg0, %c0_i32 : i32, i32
  }
  func.func @transform_3(%arg0: i32) -> (i32, i32) {
    %c0_i32 = arith.constant 0 : i32
    %c0_i32_0 = arith.constant 0 : i32
    %c0_i32_1 = arith.constant 0 : i32
    return %c0_i32, %c0_i32_0 : i32, i32
  }
  func.func @transform_4(%arg0: i32) -> (i32, i32) {
    %c0_i32 = arith.constant 0 : i32
    %c0_i32_0 = arith.constant 0 : i32
    %c0_i32_1 = arith.constant 0 : i32
    return %c0_i32, %c0_i32_0 : i32, i32
  }
  func.func @transform_5(%arg0: i32) -> (i32, i32) {
    %c0_i32 = arith.constant 0 : i32
    %c0_i32_0 = arith.constant 0 : i32
    %c0_i32_1 = arith.constant 0 : i32
    return %c0_i32, %c0_i32_0 : i32, i32
  }
  func.func @transform_6(%arg0: i32) -> (i32, i32) {
    %c0_i32 = arith.constant 0 : i32
    %c0_i32_0 = arith.constant 0 : i32
    %c0_i32_1 = arith.constant 0 : i32
    return %c0_i32, %c0_i32_0 : i32, i32
  }
  func.func @transform_7(%arg0: i32) -> (i32, i32) {
    %c0_i32 = arith.constant 0 : i32
    %c0_i32_0 = arith.constant 0 : i32
    %c0_i32_1 = arith.constant 0 : i32
    return %c0_i32, %c0_i32_0 : i32, i32
  }
  func.func @transform_8(%arg0: i32) -> (i32, i32) {
    %c0_i32 = arith.constant 0 : i32
    %c0_i32_0 = arith.constant 0 : i32
    return %arg0, %c0_i32 : i32, i32
  }
}

</mosaic_0001>

<bundles_post_ra>
// kernel: simple_self_attention.1
= control target key start
LH: loop header
LB: loop body
LE: loop exit
PB: predicated region body
PF: predicated region fallthrough
CT: control target
= control target key end

     0   :  { %13 = vsyncpa [#allocation3], 0  ;;  %s725_s0 = inlined_call_operand.vmem [shape: bf16[2,8,4], index: 0, kind: input, shape index: {}]   ;;  %s726_s1 = inlined_call_operand.vmem [shape: f32[2,8,1], index: 1, kind: input, shape index: {}]   ;;  %s727_s2 = inlined_call_operand.vmem [shape: f32[2,128], index: 2, kind: input, shape index: {}]   ;;  %s728_s3 = inlined_call_operand.vmem [shape: bf16[4,256], index: 3, kind: input, shape index: {}]   ;;  %s729_s4 = inlined_call_operand.vmem [shape: f32[1,256], index: 4, kind: input, shape index: {}]   ;;  %s730_s5 = inlined_call_operand.hbm [shape: f32[128,128], index: 5, kind: input, shape index: {}]   ;;  %s731_s6 = inlined_call_operand.hbm [shape: f32[128,128], index: 6, kind: input, shape index: {}]   ;;  %s732_s7 = inlined_call_operand.vmem [shape: f32[1,128], index: 7, kind: input, shape index: {}]   ;;  %s733_s8 = inlined_call_operand.hbm [shape: f32[2,128], index: 8, kind: output, shape index: {}]  }
   0x1   :  { %14 = vsyncpa [#allocation6], 0 }
   0x2   :  { %15 = vsyncpa [#allocation4], 0  ;;  %s589_s27 = smov [#allocation2]  }
   0x3   :  { %s31_s28 = sshll.u32 %s589_s27, 4  ;;  %s32_s28 = int_to_ptr.vmem [resolvable:$true] %s31_s28 }
   0x4   :  { %s531_s29 = scalar_lea.vmem %s32_s28, 2048  ;;  %p536_p1 = scmp.lt.s32.totalorder %s32_s28, %s32_s28 }
   0x5   :  { %p532_p0 = scmp.ne.s32.totalorder %s32_s28, %s531_s29  ;;  %p537_p2 = scmp.lt.s32.totalorder %s531_s29, %s531_s29 }
   0x7   :  { %p538_p3 = por %p537_p2, %p536_p1 }
   0x9   :  { %p539_p4 = pnand %p538_p3, %p532_p0 }
   0xb   :  { %542 = shalt.err (!%p539_p4)
}
   0xc   :  { %s590_s30 = smov 128   ;;  %s591_s9 = smov 8  }
   0xd   :  { %37 = dma.hbm_to_vmem [thread:$0]  %s730_s5, 2048, %s32_s28, [#allocation3], %s590_s30, %s590_s30, %s591_s9  }
   0xe   :  { %s592_s12 = smov [#allocation5]  }
   0xf   :  { %s43_s13 = sshll.u32 %s592_s12, 4  ;;  %s44_s13 = int_to_ptr.vmem [resolvable:$true] %s43_s13 }
  0x10   :  { %s551_s14 = scalar_lea.vmem %s44_s13, 2048  ;;  %p556_p6 = scmp.lt.s32.totalorder %s44_s13, %s44_s13 }
  0x11   :  { %p552_p5 = scmp.ne.s32.totalorder %s44_s13, %s551_s14  ;;  %p557_p7 = scmp.lt.s32.totalorder %s551_s14, %s551_s14 }
  0x13   :  { %p558_p8 = por %p557_p7, %p556_p6 }
  0x15   :  { %p559_p9 = pnand %p558_p8, %p552_p5 }
  0x17   :  { %562 = shalt.err (!%p559_p9)
}
  0x18   :  { %49 = dma.hbm_to_vmem [thread:$0]  %s731_s6, 2048, %s44_s13, [#allocation6], %s590_s30, %s590_s30, %s591_s9  }
  0x19   :  { %583 = dma.done.wait [#allocation3], 2048  }
  0x1a   :  { %584 = vsyncadd [#allocation3], 4294965248 }
  0x1b   :  { %585 = dma.done.wait [#allocation6], 2048  }
  0x1c   :  { %586 = vsyncadd [#allocation6], 4294965248  ;;  %v593_v0 = vmov 0   ;;  %vm92_vm0 = vcmask 1041408   ;;  %v512_v4 = vld [vmem:[%s725_s0] sm:$0xff]   ;;  %vm88_vm1 = vcmask 31744   ;;  %v64_v5 = vlaneseq }
  0x1d   :  { %131 = vmatprep.mubr.bf16.mxu0 %v593_v0  ;;  %510 = vset.pattern.permute.xlu0 %v593_v0  ;;  %v394_v1 = vld.sshfl [vmem:[%s728_s3] sm:$0x33 pattern:$0x76325410]  ;;  %v594_v24 = vmov 0.0   ;;  %v220_v25 = vld [vmem:[#allocation5 + $0x78] sm:$0xff] }
  0x1e   :  { %511 = vset.pattern.permute.xlu1 %v593_v0  ;;  %v87_v2 = vcombine.high %v394_v1, %v394_v1  ;;  %v94_v3 = vsel %vm92_vm0, %v394_v1, 0  ;;  %v654_v6 = vshrl.u32 %v64_v5, 7  ;;  %v660_v8 = vld [vmem:[%s729_s4] sm:$0x3]  ;;  %432 = vmatprep.subr.mxu1 %v594_v24  ;;  %v219_v26 = vld [vmem:[#allocation5 + $0x70] sm:$0xff]  ;;  %v204_v27 = vld [vmem:[#allocation2 + $0x78] sm:$0xff] }
  0x1f   :  { %v162_v15 = vld [vmem:[%s726_s1] sm:$0xff]  ;;  %433 = vmatpush3.msra.mxu1 %v220_v25  ;;  %v218_v28 = vld [vmem:[#allocation5 + $0x68] sm:$0xff]  ;;  %v203_v29 = vld [vmem:[#allocation2 + $0x70] sm:$0xff]  ;;  %vm595_vm2 = vmmov 0   ;;  %vm293_vm3 = vcmask 1041409   ;;  %s596_s24 = smov [#allocation7]  }
  0x20   :  { %395 = vmatprep.subr.msk.bf16.mxu0 %vm92_vm0, %v87_v2  ;;  %v66_v7 = vsub.s32 0, %v654_v6  ;;  %434 = vmatprep.subr.mxu1 %v594_v24  ;;  %v202_v30 = vld [vmem:[#allocation2 + $0x68] sm:$0xff]  ;;  %v217_v31 = vld [vmem:[#allocation5 + $0x60] sm:$0xff]  ;;  %v216_v33 = vld [vmem:[#allocation5 + $0x58] sm:$0xff]  ;;  %v70_v61 = vsub.s32 1, %v654_v6  ;;  %s383_s25 = sshll.u32 %s596_s24, 4  ;;  %s384_s25 = int_to_ptr.vmem [resolvable:$true] %s383_s25 }
  0x21   :  { %114 = vmatpush1.bf16.msra.mxu0 %v94_v3  ;;  %435 = vmatpush3.msra.mxu1 %v219_v26  ;;  %v163_v32 = vld [vmem:[%s726_s1 + $0x8] sm:$0xff]  ;;  %v201_v34 = vld [vmem:[#allocation2 + $0x60] sm:$0xff]  ;;  %v215_v35 = vld [vmem:[#allocation5 + $0x50] sm:$0xff]  ;;  %s563_s26 = scalar_lea.vmem %s384_s25, 32  ;;  %p568_p11 = scmp.lt.s32.totalorder %s384_s25, %s384_s25 }
  0x22   :  { %v67_v9 = vrot.slane %v660_v8, %v66_v7  ;;  %467 = vmatprep.subr.mxu0 %v594_v24  ;;  %436 = vmatprep.subr.mxu1 %v594_v24  ;;  %v200_v36 = vld [vmem:[#allocation2 + $0x58] sm:$0xff]  ;;  %v214_v37 = vld [vmem:[#allocation5 + $0x48] sm:$0xff]  ;;  %v199_v38 = vld [vmem:[#allocation2 + $0x50] sm:$0xff]  ;;  %v71_v62 = vrot.slane %v660_v8, %v70_v61  ;;  %p564_p10 = scmp.ne.s32.totalorder %s384_s25, %s563_s26  ;;  %p569_p12 = scmp.lt.s32.totalorder %s563_s26, %s563_s26 }
  0x23   :  { %437 = vmatpush3.msra.mxu1 %v218_v28  ;;  %v213_v39 = vld [vmem:[#allocation5 + $0x40] sm:$0xff]  ;;  %v198_v40 = vld [vmem:[#allocation2 + $0x48] sm:$0xff]  ;;  %v212_v41 = vld [vmem:[#allocation5 + $0x38] sm:$0xff]  ;;  %464 = vmatprep.mubr.msk.f32.mxu1 %vm595_vm2, %v594_v24 }
  0x24   :  { %396 = vmatmul.mubr.msk.bf16.vlgmr.msra.gmra.mxu0 %vm88_vm1, %v512_v4  ;;  %438 = vmatprep.subr.mxu1 %v594_v24  ;;  %v197_v42 = vld [vmem:[#allocation2 + $0x40] sm:$0xff]  ;;  %v211_v43 = vld [vmem:[#allocation5 + $0x30] sm:$0xff]  ;;  %v196_v44 = vld [vmem:[#allocation2 + $0x38] sm:$0xff]  ;;  %p570_p13 = por %p569_p12, %p568_p11 }
  0x25   :  { %468 = vmatpush3.msra.mxu0 %v204_v27  ;;  %439 = vmatpush3.msra.mxu1 %v217_v31  ;;  %v210_v45 = vld [vmem:[#allocation5 + $0x28] sm:$0xff]  ;;  %v195_v46 = vld [vmem:[#allocation2 + $0x30] sm:$0xff]  ;;  %v209_v47 = vld [vmem:[#allocation5 + $0x20] sm:$0xff] }
  0x26   :  { %469 = vmatprep.subr.mxu0 %v594_v24  ;;  %440 = vmatprep.subr.mxu1 %v594_v24  ;;  %v194_v48 = vld [vmem:[#allocation2 + $0x28] sm:$0xff]  ;;  %v208_v49 = vld [vmem:[#allocation5 + $0x18] sm:$0xff]  ;;  %v193_v50 = vld [vmem:[#allocation2 + $0x20] sm:$0xff]  ;;  %p571_p0 = pnand %p570_p13, %p564_p10 }
  0x27   :  { %470 = vmatpush3.msra.mxu0 %v203_v29  ;;  %441 = vmatpush3.msra.mxu1 %v216_v33  ;;  %v207_v51 = vld [vmem:[#allocation5 + $0x10] sm:$0xff]  ;;  %v192_v52 = vld [vmem:[#allocation2 + $0x18] sm:$0xff]  ;;  %v206_v53 = vld [vmem:[#allocation5 + $0x8] sm:$0xff] }
  0x28   :  { %471 = vmatprep.subr.mxu0 %v594_v24  ;;  %442 = vmatprep.subr.mxu1 %v594_v24  ;;  %v191_v54 = vld [vmem:[#allocation2 + $0x10] sm:$0xff]  ;;  %v205_v55 = vld [vmem:[#allocation5] sm:$0xff]  ;;  %v190_v56 = vld [vmem:[#allocation2 + $0x8] sm:$0xff] }
  0x29   :  { %472 = vmatpush3.msra.mxu0 %v202_v30  ;;  %443 = vmatpush3.msra.mxu1 %v215_v35  ;;  %v188_v57 = vld [vmem:[%s727_s2] sm:$0x3] }
  0x2a   :  { %473 = vmatprep.subr.mxu0 %v594_v24  ;;  %444 = vmatprep.subr.mxu1 %v594_v24  ;;  %v189_v58 = vld [vmem:[#allocation2] sm:$0xff] }
  0x2b   :  { %474 = vmatpush3.msra.mxu0 %v201_v34  ;;  %445 = vmatpush3.msra.mxu1 %v214_v37  ;;  %v397_v28 = vld [vmem:[%s732_s7] ss:$0 sm:$0xff] }
  0x2c   :  { %475 = vmatprep.subr.mxu0 %v594_v24  ;;  %446 = vmatprep.subr.mxu1 %v594_v24 }
  0x2d   :  { %476 = vmatpush3.msra.mxu0 %v200_v36  ;;  %447 = vmatpush3.msra.mxu1 %v213_v39 }
  0x2e   :  { %477 = vmatprep.subr.mxu0 %v594_v24  ;;  %448 = vmatprep.subr.mxu1 %v594_v24 }
  0x2f   :  { %478 = vmatpush3.msra.mxu0 %v199_v38  ;;  %449 = vmatpush3.msra.mxu1 %v212_v41 }
  0x30   :  { %479 = vmatprep.subr.mxu0 %v594_v24  ;;  %450 = vmatprep.subr.mxu1 %v594_v24 }
  0x31   :  { %480 = vmatpush3.msra.mxu0 %v198_v40  ;;  %451 = vmatpush3.msra.mxu1 %v211_v43 }
  0x32   :  { %481 = vmatprep.subr.mxu0 %v594_v24  ;;  %452 = vmatprep.subr.mxu1 %v594_v24 }
  0x33   :  { %482 = vmatpush3.msra.mxu0 %v197_v42  ;;  %453 = vmatpush3.msra.mxu1 %v210_v45 }
  0x34   :  { %483 = vmatprep.subr.mxu0 %v594_v24  ;;  %454 = vmatprep.subr.mxu1 %v594_v24 }
  0x35   :  { %484 = vmatpush3.msra.mxu0 %v196_v44  ;;  %455 = vmatpush3.msra.mxu1 %v209_v47 }
  0x36   :  { %485 = vmatprep.subr.mxu0 %v594_v24  ;;  %456 = vmatprep.subr.mxu1 %v594_v24 }
  0x37   :  { %486 = vmatpush3.msra.mxu0 %v195_v46  ;;  %457 = vmatpush3.msra.mxu1 %v208_v49 }
  0x38   :  { %487 = vmatprep.subr.mxu0 %v594_v24  ;;  %458 = vmatprep.subr.mxu1 %v594_v24 }
  0x39   :  { %488 = vmatpush3.msra.mxu0 %v194_v48  ;;  %459 = vmatpush3.msra.mxu1 %v207_v51 }
  0x3a   :  { %489 = vmatprep.subr.mxu0 %v594_v24  ;;  %460 = vmatprep.subr.mxu1 %v594_v24 }
  0x3b   :  { %490 = vmatpush3.msra.mxu0 %v193_v50  ;;  %461 = vmatpush3.msra.mxu1 %v206_v53 }
  0x3c   :  { %491 = vmatprep.subr.mxu0 %v594_v24  ;;  %462 = vmatprep.subr.mxu1 %v594_v24 }
  0x3d   :  { %492 = vmatpush3.msra.mxu0 %v192_v52  ;;  %463 = vmatpush3.msra.mxu1 %v205_v55 }
  0x3e   :  { %493 = vmatprep.subr.mxu0 %v594_v24  ;;  %465 = vmatmul.mubr.f32.vlgmr.msra.gmra.mxu1 %v188_v57 }
  0x3f   :  { %494 = vmatpush3.msra.mxu0 %v191_v54  ;;  %499 = vmatprep.mubr.msk.f32.mxu0 %vm595_vm2, %v594_v24 }
  0x40   :  { %495 = vmatprep.subr.mxu0 %v594_v24 }
  0x41   :  { %496 = vmatpush3.msra.mxu0 %v190_v56 }
  0x42   :  { %497 = vmatprep.subr.mxu0 %v594_v24 }
  0x43   :  { %498 = vmatpush3.msra.mxu0 %v189_v58 }
  0xe4   :  { %v133_v10 = vpop.f32.mrf.mxu0 }
  0xe5   :  { %v134_v11 = vadd.f32 %v133_v10, %v67_v9 }
  0xe6   :  { %v663_v12 = vpop.f32.mrf.mxu0 }
  0xe7   :  { %142 = vmax.xlane.f32.xlu0 %v134_v11  ;;  %v136_v0 = vadd.f32 %v663_v12, %v71_v62 }
  0xe8   :  { %v137_v13 = vpop.f32.mrf.mxu0 }
  0xe9   :  { %v138_v14 = vadd.f32 %v137_v13, %v67_v9 }
  0xea   :  { %v139_v2 = vpop.f32.mrf.mxu0 }
  0xeb   :  { %144 = vmax.xlane.f32.xlu0 %v138_v14  ;;  %v140_v7 = vadd.f32 %v139_v2, %v71_v62 }
  0xfe   :  { %v287_v26 = vpop.f32.mrf.mxu1 }
 0x101   :  { %166 = vperm.xlu0 %510, %v162_v15  }
 0x170   :  { %v143_v16 = vpop.xlane.xlu0 %142 }
 0x171   :  { %v146_v17 = vsub.f32 %v134_v11, %v143_v16 }
 0x173   :  { %v148_v18 = vmul.f32 1.442695, %v146_v17 }
 0x174   :  { %v145_v19 = vpop.xlane.xlu0 %144 }
 0x175   :  { %513 = vpow2.f32 %v148_v18  ;;  %v147_v20 = vsub.f32 %v138_v14, %v145_v19 }
 0x177   :  { %v150_v21 = vmul.f32 1.442695, %v147_v20 }
 0x179   :  { %515 = vpow2.f32 %v150_v21 }
 0x17c   :  { %v167_v3 = vpop.permute.xlu0 %166 }
 0x182   :  { %v668_v22 = vpop.eup %513 }
 0x183   :  { %152 = vadd.xlane.f32.xlu1 %v668_v22 }
 0x186   :  { %v671_v23 = vpop.eup %515 }
 0x187   :  { %154 = vadd.xlane.f32.xlu1 %v671_v23 }
 0x198   :  { %171 = vperm.xlu1 %511, %v163_v32  }
 0x20c   :  { %v153_v59 = vpop.xlane.xlu1 %152 }
 0x20d   :  { %517 = vrcp.f32 %v153_v59 }
 0x210   :  { %v155_v60 = vpop.xlane.xlu1 %154 }
 0x211   :  { %519 = vrcp.f32 %v155_v60 }
 0x214   :  { %v172_v11 = vpop.permute.xlu1 %171 }
 0x21a   :  { %v518_v63 = vpop.eup %517 }
 0x21b   :  { %v158_v1 = vmul.f32 %v518_v63, %v668_v22 }
 0x21d   :  { %v160_v4 = vmul.f32 %v158_v1, %v136_v0 }
 0x21e   :  { %v520_v5 = vpop.eup %519 }
 0x21f   :  { %v174_v9 = vmul.f32 %v167_v3, %v160_v4  ;;  %v159_v10 = vmul.f32 %v520_v5, %v671_v23  ;;  %v466_v23 = vpop.f32.mrf.mxu1 }
 0x221   :  { %v176_v13 = vrot.slane %v174_v9, 4  ;;  %v161_v14 = vmul.f32 %v159_v10, %v140_v7 }
 0x223   :  { %v177_v15 = vadd.f32 %v176_v13, %v174_v9  ;;  %v175_v6 = vmul.f32 %v172_v11, %v161_v14 }
 0x225   :  { %v178_v16 = vrot.slane %v177_v15, 2  ;;  %v182_v8 = vrot.slane %v175_v6, 4 }
 0x227   :  { %v179_v17 = vadd.f32 %v178_v16, %v177_v15  ;;  %v183_v18 = vadd.f32 %v182_v8, %v175_v6 }
 0x229   :  { %v184_v12 = vrot.slane %v183_v18, 2  ;;  %v180_v19 = vrot.slane %v179_v17, 1 }
 0x22b   :  { %v185_v20 = vadd.f32 %v184_v12, %v183_v18  ;;  %v181_v22 = vadd.f32 %v180_v19, %v179_v17 }
 0x22d   :  { %v186_v21 = vrot.slane %v185_v20, 1 }
 0x22f   :  { %v187_v24 = vadd.f32 %v186_v21, %v185_v20 }
 0x231   :  { %v294_v25 = vsel %vm293_vm3, %v187_v24, %v181_v22 }
 0x232   :  { %500 = vmatmul.mubr.f32.vlgmr.msra.gmra.mxu0 %v294_v25 }
 0x2f2   :  { %v362_v27 = vpop.f32.mrf.mxu0 }
 0x2f3   :  { %v363_v29 = vadd.f32 %v362_v27, %v287_v26 }
 0x2f4   :  { %v501_v30 = vpop.f32.mrf.mxu0 }
 0x2f5   :  { %v373_v31 = vadd.f32 %v397_v28, %v363_v29 }
 0x2f7   :  { %521 = vtanh.f32 %v373_v31 }
 0x304   :  { %v522_v32 = vpop.eup %521 }
 0x305   :  { %v375_v33 = vadd.f32 %v522_v32, %v188_v57 }
 0x307   :  { %376 = vst [vmem:[#allocation7] sm:$0x3] %v375_v33 }
 0x308   :  { %574 = shalt.err (!%p571_p0)
}
 0x309   :  { %386 = dma.vmem_to_hbm [thread:$0]  %s384_s25, 32, %s733_s8, [#allocation4]  }
 0x30a   :  { %587 = dma.done.wait [#allocation4], 32  }
 0x30b   :  { %588 = vsyncadd [#allocation4], 4294967264 }
 0x30c   :  { %390 = vsyncpa [#allocation3], 1 }
 0x30d   :  { %391 = vsyncpa [#allocation6], 1 }
 0x30e   :  { %392 = vsyncpa [#allocation4], 1 }

</bundles_post_ra>
